<compile_context>
chip_gen: v7x
topology: tpu7x:2x2x1
jax: 0.10.0
libtpu: 0.0.40
codegen_flags: <defaults>
</compile_context>

<pallas_src>
import jax
import jax.numpy as jnp
import numpy as np
from jax.experimental import pallas as pl
from jax.experimental.pallas import tpu as pltpu


# ---------------------------------------------------------------------------
# Small helpers
# ---------------------------------------------------------------------------
def _round_up(x, m):
    return (x + m - 1) // m * m


def _cdiv(a, b):
    return (a + b - 1) // b


def _vmem_capacity_bytes():
    """Per-core VMEM capacity; conservative (v7x) fallback if query fails."""
    try:
        return int(pltpu.get_tpu_info().vmem_capacity_bytes)
    except Exception:
        return 64 << 20


def _select_spatial_tile(hw, cin, cout, batch, *, lane=128, max_t=65536):
    """Pick the spatial tile T (multiple of 128) and report its VMEM slab size.

    Budgeting accounts for:
      * f32 sublane padding: channel dims round up to 8 in VMEM,
      * double buffering of both the input (Cin, T) and output (Cout, T) slabs,
      * per-generation VMEM capacity (v7x has half of v5e/v6e),
      * keeping >= 4 total grid steps so both v7x TensorCores have work.
    """
    cin_p = _round_up(max(cin, 1), 8)
    cout_p = _round_up(max(cout, 1), 8)
    bytes_per_col = 2 * (cin_p + cout_p) * 4          # double-buffered, f32

    cap = _vmem_capacity_bytes()
    slab_budget = max(2 << 20, min(cap // 4, 24 << 20))  # 16 MiB on v7x, 24 MiB on v5e/v6e

    t_budget = max(lane, (slab_budget // bytes_per_col) // lane * lane)
    t = min(t_budget, max_t, _round_up(hw, lane))
    t = max(lane, (t // lane) * lane)

    # Keep at least 4 grid steps (when there is enough work) for megacore.
    while t > lane and batch * _cdiv(hw, t) < 4:
        t = max(lane, (t // 2) // lane * lane)

    slab_bytes = bytes_per_col * t
    return t, slab_bytes


# ---------------------------------------------------------------------------
# Kernel: fused 1x1 conv (channel matmul) + bias
# ---------------------------------------------------------------------------
def _outconv_kernel(x_ref, w_ref, b_ref, o_ref):
    # x_ref: (1, Cin, T)  w_ref: (Cout, Cin)  b_ref: (Cout, 1)  o_ref: (1, Cout, T)
    x = x_ref[0]                                                     # (Cin, T), lane-dense
    y = jnp.dot(w_ref[...], x, preferred_element_type=jnp.float32)  # (Cout, T) f32
    o_ref[0] = (y + b_ref[...]).astype(o_ref.dtype)


def outconv_forward(x_nchw, w, b):
    """1x1 conv: x (B, Cin, H, W) NCHW, w (Cout, Cin), b (Cout,) -> (B, Cout, H, W)."""
    B, Cin, H, W = x_nchw.shape
    Cout = w.shape[0]
    HW = H * W

    T, slab_bytes = _select_spatial_tile(HW, Cin, Cout, B)
    n_spatial = _cdiv(HW, T)

    xf = x_nchw.reshape(B, Cin, HW)                  # free, layout-preserving view
    b2 = b.astype(jnp.float32).reshape(Cout, 1)      # broadcast over the lane axis

    # Raise scoped VMEM above the v5e/v6e defaults; stay under v7x's 64 MiB.
    vmem_limit = int(min(56 << 20, max(24 << 20, slab_bytes + (4 << 20))))

    out = pl.pallas_call(
        _outconv_kernel,
        out_shape=jax.ShapeDtypeStruct((B, Cout, HW), x_nchw.dtype),
        grid_spec=pltpu.PrefetchScalarGridSpec(
            num_scalar_prefetch=0,
            grid=(B, n_spatial),                     # ragged last block is masked
            in_specs=[
                pl.BlockSpec((1, Cin, T), lambda i, s: (i, 0, s)),
                pl.BlockSpec((Cout, Cin), lambda i, s: (0, 0)),
                pl.BlockSpec((Cout, 1), lambda i, s: (0, 0)),
            ],
            out_specs=pl.BlockSpec((1, Cout, T), lambda i, s: (i, 0, s)),
        ),
        compiler_params=pltpu.CompilerParams(
            dimension_semantics=("parallel", "parallel"),
            vmem_limit_bytes=vmem_limit,
        ),
    )(xf, w, b2)
    return out.reshape(B, Cout, H, W)


# ---------------------------------------------------------------------------
# Parameter construction (deterministic, synthetic, PyTorch Conv2d layout)
# ---------------------------------------------------------------------------
def make_outconv_params(key, cin, cout):
    k1, k2 = jax.random.split(key, 2)
    # PyTorch Conv2d(kernel_size=1) weight layout: (Cout, Cin, 1, 1)
    w_pt = jax.random.normal(k1, (cout, cin, 1, 1), jnp.float32) * 0.1
    bias = jax.random.normal(k2, (cout,), jnp.float32) * 0.1
    return w_pt.reshape(cout, cin), bias


# ---------------------------------------------------------------------------
# Pure-JAX reference (correctness check)
# ---------------------------------------------------------------------------
def _ref_forward(x_nchw, w, b):
    y = jnp.einsum("bchw,oc->bohw", x_nchw, w)
    return y + b[None, :, None, None]


if __name__ == "__main__":
    key = jax.random.PRNGKey(0)
    kx, kp, kx2 = jax.random.split(key, 3)

    in_channels, out_channels = 4, 8
    w, b = make_outconv_params(kp, in_channels, out_channels)

    # Test 1: lane-aligned spatial size (HW multiple of 128).
    B, H, W = 2, 16, 16
    x = jax.random.normal(kx, (B, in_channels, H, W), jnp.float32)
    out = jax.block_until_ready(outconv_forward(x, w, b))
    ref = jax.block_until_ready(_ref_forward(x, w, b))
    assert out.shape == (B, out_channels, H, W), out.shape
    np.testing.assert_allclose(np.asarray(out), np.asarray(ref), rtol=1e-5, atol=1e-5)

    # Test 2: ragged spatial size (HW = 320, not a multiple of the tile) to
    # exercise the masked last block.
    H2, W2 = 16, 20
    x2 = jax.random.normal(kx2, (B, in_channels, H2, W2), jnp.float32)
    out2 = jax.block_until_ready(outconv_forward(x2, w, b))
    ref2 = jax.block_until_ready(_ref_forward(x2, w, b))
    assert out2.shape == (B, out_channels, H2, W2), out2.shape
    np.testing.assert_allclose(np.asarray(out2), np.asarray(ref2), rtol=1e-5, atol=1e-5)

    print("KERNEL_OK")
</pallas_src>

<mosaic_0001>
module attributes {stable_mosaic.version = 11 : i64} {
  func.func @_outconv_kernel(%arg0: i32, %arg1: i32, %arg2: memref<1x4x128xf32, #tpu.memory_space<vmem>>, %arg3: memref<8x4xf32, #tpu.memory_space<vmem>>, %arg4: memref<8x1xf32, #tpu.memory_space<vmem>>, %arg5: memref<1x8x128xf32, #tpu.memory_space<vmem>>) attributes {dimension_semantics = [#tpu.dimension_semantics<parallel>, #tpu.dimension_semantics<parallel>], iteration_bounds = array<i64: 2, 2>, scalar_prefetch = 0 : i64, scratch_operands = 0 : i64, tpu.core_type = #tpu.core_type<tc>, window_params = [{transform_indices = @transform_0, window_bounds = array<i64: 1, 4, 128>}, {pipeline_mode = #tpu.pipeline_mode<synchronous>, transform_indices = @transform_1, window_bounds = array<i64: 8, 4>}, {pipeline_mode = #tpu.pipeline_mode<synchronous>, transform_indices = @transform_2, window_bounds = array<i64: 8, 1>}, {transform_indices = @transform_3, window_bounds = array<i64: 1, 8, 128>}]} {
    %c0 = arith.constant 0 : index
    %c0_0 = arith.constant 0 : index
    %c0_1 = arith.constant 0 : index
    %0 = vector.load %arg2[%c0, %c0_0, %c0_1] : memref<1x4x128xf32, #tpu.memory_space<vmem>>, vector<1x4x128xf32>
    %1 = vector.shape_cast %0 : vector<1x4x128xf32> to vector<4x128xf32>
    %c0_2 = arith.constant 0 : index
    %c0_3 = arith.constant 0 : index
    %2 = vector.load %arg3[%c0_2, %c0_3] : memref<8x4xf32, #tpu.memory_space<vmem>>, vector<8x4xf32>
    %cst = arith.constant dense<0.000000e+00> : vector<8x128xf32>
    %3 = tpu.matmul %2, %1, %cst {dimension_numbers = #tpu.dot_dimension_numbers<[1], [0], [0], [1], [0, 0, 1, 1], [], []>} : vector<8x4xf32>, vector<4x128xf32>, vector<8x128xf32> -> vector<8x128xf32>
    %c0_4 = arith.constant 0 : index
    %c0_5 = arith.constant 0 : index
    %4 = vector.load %arg4[%c0_4, %c0_5] : memref<8x1xf32, #tpu.memory_space<vmem>>, vector<8x1xf32>
    %5 = vector.broadcast %4 : vector<8x1xf32> to vector<8x128xf32>
    %6 = arith.addf %3, %5 : vector<8x128xf32>
    %c0_6 = arith.constant 0 : index
    %c0_7 = arith.constant 0 : index
    %c0_8 = arith.constant 0 : index
    %7 = vector.load %arg5[%c0_6, %c0_7, %c0_8] : memref<1x8x128xf32, #tpu.memory_space<vmem>>, vector<1x8x128xf32>
    %8 = vector.shape_cast %7 : vector<1x8x128xf32> to vector<8x128xf32>
    %9 = vector.shape_cast %6 : vector<8x128xf32> to vector<1x8x128xf32>
    tpu.vector_store %arg5[%c0_6, %c0_7, %c0_8], %9 {strides = array<i32>} : memref<1x8x128xf32, #tpu.memory_space<vmem>>, vector<1x8x128xf32>,
    return
  }
  func.func @transform_0(%arg0: i32, %arg1: i32) -> (i32, i32, i32) {
    %c0_i32 = arith.constant 0 : i32
    %c0_i32_0 = arith.constant 0 : i32
    return %arg0, %c0_i32, %arg1 : i32, i32, i32
  }
  func.func @transform_1(%arg0: i32, %arg1: i32) -> (i32, i32) {
    %c0_i32 = arith.constant 0 : i32
    %c0_i32_0 = arith.constant 0 : i32
    %c0_i32_1 = arith.constant 0 : i32
    return %c0_i32, %c0_i32_0 : i32, i32
  }
  func.func @transform_2(%arg0: i32, %arg1: i32) -> (i32, i32) {
    %c0_i32 = arith.constant 0 : i32
    %c0_i32_0 = arith.constant 0 : i32
    %c0_i32_1 = arith.constant 0 : i32
    return %c0_i32, %c0_i32_0 : i32, i32
  }
  func.func @transform_3(%arg0: i32, %arg1: i32) -> (i32, i32, i32) {
    %c0_i32 = arith.constant 0 : i32
    %c0_i32_0 = arith.constant 0 : i32
    return %arg0, %c0_i32, %arg1 : i32, i32, i32
  }
}

</mosaic_0001>

<bundles_post_ra>
// kernel: tpu_custom_call.1
= control target key start
LH: loop header
LB: loop body
LE: loop exit
PB: predicated region body
PF: predicated region fallthrough
CT: control target
= control target key end

     0   :  { %8 = vsyncpa [#allocation3], 0  ;;  %s735_s0 = inlined_call_operand.vmem [shape: f32[2,4,256], index: 0, kind: input, shape index: {}]   ;;  %s736_s1 = inlined_call_operand.vmem [shape: f32[8,4], index: 1, kind: input, shape index: {}]   ;;  %s737_s2 = inlined_call_operand.vmem [shape: f32[8,1], index: 2, kind: input, shape index: {}]   ;;  %s738_s3 = inlined_call_operand.hbm [shape: f32[2,8,256], index: 3, kind: output, shape index: {}]  }
   0x1   :  { %10 = vsyncpa [#allocation3 + $0x1], 0  ;;  %s592_s12 = smov 0   ;;  %s594_s13 = smov 0  }
   0x2   :  { %s596_s14 = smov 0   ;;  %s598_s15 = smov 0  }
   0x3   :  { %s600_s16 = smov 0   ;;  %s602_s17 = smov 0  }
   0x4   :  { %s604_s18 = smov 0   ;;  %s606_s19 = smov 0  }
   0x5 LB: > { %s375_s20 = sadd.s32 4294967295, %s566_s19   ;;  %s376_s21 = sadd.s32 4294967294, %s566_s19   ;;  %s566_s19 = sphi %s606_s19, %s16_s19   ;;  %s562_s18 = sphi %s604_s18, %s747_s18   ;;  %s558_s17 = sphi %s602_s17, %s746_s17   ;;  %s554_s16 = sphi %s600_s16, %s745_s16   ;;  %s550_s15 = sphi %s598_s15, %s744_s15   ;;  %s546_s14 = sphi %s596_s14, %s743_s14   ;;  %s542_s13 = sphi %s594_s13, %s742_s13   ;;  %s538_s12 = sphi %s592_s12, %s741_s12  }
   0x6   : > { %s25_s22 = sadd.s32 1, %s558_s17  ;;  %s28_s23 = sadd.s32 1, %s562_s18 }
   0x7   : > { %p26_p0 = scmp.ge.s32.totalorder %s25_s22, 2  ;;  %p117_p1 = scmp.ne.s32.totalorder %s546_s14, %s542_s13 }
   0x8   : > { %p118_p2 = scmp.eq.s32.totalorder %s375_s20, 3  ;;  %p123_p5 = scmp.ne.s32.totalorder %s542_s13, %s538_s12 }
   0x9   : > { %s749_s22 = smov (%p26_p0, %s25_s22), 0  ;;  %s751_s23 = smov (!%p26_p0, %s28_s23), %s562_s18 }
   0xa   : > { %s103_s24 = ssub.s32 %s558_s17, %s749_s22  ;;  %p643_p3 = por %p118_p2, %p117_p1 }
   0xb   : > { %p30_p4 = scmp.ge.s32.totalorder %s751_s23, 2  ;;  %p124_p6 = scmp.eq.s32.totalorder %s376_s21, 3 }
   0xc   : > { %p379_p7 = scmp.ge.s32.totalorder %s566_s19, 1  ;;  %p159_p9 = scmp.lt.s32.totalorder %s566_s19, 5 }
   0xd   : > { %s753_s23 = smov (%p30_p4, %s751_s23), 0  ;;  %p652_p8 = por %p124_p6, %p123_p5 }
   0xe   : > { %s102_s27 = ssub.s32 %s562_s18, %s753_s23  ;;  %s107_s28 = sadd.s32 1, %s546_s14 }
   0xf   : > { %s104_s29 = sor.u32 %s103_s24, %s102_s27  ;;  %p160_p10 = pnand %p379_p7, %p159_p9 }
  0x10   : > { %p105_p11 = scmp.eq.s32.totalorder %s104_s29, 0  ;;  %p186_p12 = scmp.lt.s32.totalorder (!%p160_p10), %s554_s16, 1  ;;  %v568_v0 = vmov (!%p160_p10), 0.0   ;;  %vm569_vm0 = vmmov (!%p160_p10), 0   ;;  %v196_v1 = vld [vmem:[%s737_s2] sm:$0xff] (!%p160_p10)  ;;  %v570_v2 = vmov (!%p160_p10), 0  }
  0x11   : > { %163 = sbr.rel (%p160_p10) target bundleno = 260 (0x104), region = 32  ;;  %p188_p13 = scmp.lt.s32.totalorder (!%p160_p10), %s550_s15, 1  ;;  %392 = vmatprep.subr.mxu0 (!%p160_p10), %v568_v0  ;;  %394 = vmatprep.mubr.msk.f32.mxu0 (!%p160_p10), %vm569_vm0, %v568_v0  ;;  %vm206_vm1 = vcmask (!%p160_p10), 1043456   ;;  %v195_v3 = vld [vmem:[%s736_s1] sm:$0xff] (!%p160_p10)  ;;  %vm202_vm2 = vcmask (!%p160_p10), 31744  }
  0x12   : > { %s661_s30 = scalar_select %p105_p11, %s546_s14, %s107_s28  }
  0x13   : > { %471 = vset.pattern.permute.xlu0 (!%p160_p10), %v570_v2  ;;  %s183_s28 = sand.u32 (!%p160_p10), 1, %s542_s13   ;;  %s386_s4 = sshll.u32 (!%p160_p10), %s554_s16, 1 }
  0x14   : > { %199 = vperm.xlu0 (!%p160_p10), %471, %v196_v1   ;;  %s380_s29 = sshll.u32 (!%p160_p10), %s183_s28, 3  ;;  %s293_s5 = sadd.s32 (!%p160_p10), %s550_s15, %s386_s4 }
  0x15   : > { %s571_s20 = smov (!%p160_p10), [#allocation2]  }
  0x18   : > { %s187_s6 = scalar_select %p186_p12, %s554_s16, 1 }
  0x19   : > { %s189_s7 = scalar_select %p188_p13, %s550_s15, 1 }
  0x1a   : > { %s381_s8 = sshll.u32 %s187_s6, 1  ;;  %s387_s6 = sshll.u32 %s293_s5, 7 }
  0x1b   : > { %s191_s9 = sadd.s32 %s381_s8, %s189_s7  ;;  %s185_s7 = scalar_lea.vmem [#allocation2], %s380_s29 }
  0x1c   : > { %s382_s10 = sshll.u32 %s191_s9, 2  ;;  %s297_s8 = sshll.u32 %s185_s7, 4  ;;  %s684_s8 = int_to_ptr.vmem [resolvable:$true] %s297_s8 }
  0x1d   : > { %s193_s21 = scalar_lea.vmem %s735_s0, %s382_s10  ;;  %s682_s11 = scalar_lea.hbm %s738_s3, %s387_s6 }
  0x1e   : > { %v194_v4 = vld [vmem:[%s193_s21] sm:$0xf]  ;;  %s282_s16 = scalar_lea.sflag [#allocation3], %s183_s28  ;;  %s472_s15 = scalar_lea.vmem %s684_s8, 128 }
  0x1f   : > { %393 = vmatpush3.msk.msra.mxu0 %vm206_vm1, %v194_v4  ;;  %p473_p0 = scmp.ne.s32.totalorder %s684_s8, %s472_s15  ;;  %s476_s21 = sshll.u32 %s571_s20, 4  ;;  %s477_s21 = int_to_ptr.vmem [resolvable:$false] %s476_s21 }
  0x20   : > { %395 = vmatmul.mubr.msk.f32.vlgmr.msra.gmra.mrb[0].mxu0 %vm202_vm2, %v195_v3  ;;  %s478_s24 = scalar_lea.vmem %s477_s21, 256  ;;  %p479_p4 = scmp.lt.s32.totalorder %s684_s8, %s477_s21 }
  0x21   : > { %p474_p1 = pnand %p473_p0, %p643_p3  ;;  %p480_p5 = scmp.lt.s32.totalorder %s478_s24, %s472_s15 }
  0x23   : > { %p475_p2 = pneg %p474_p1  ;;  %p481_p6 = por %p480_p5, %p479_p4 }
  0x25   : > { %p482_p7 = pnand %p481_p6, %p475_p2 }
  0x93   : > { %v200_v5 = vpop.permute.xlu0 %199 }
  0xf3   : > { %v276_v6 = vpop.f32.mrb[0].mxu0 }
  0xf4   : > { %v277_v7 = vadd.f32 %v276_v6, %v200_v5  ;;  %v396_v8 = vpop.f32.mrb[1].mxu0 }
  0xf6   : > { %280 = vst [vmem:[%s185_s7] sm:$0xff] %v277_v7 }
  0xf7   : > { %485 = shalt.err (!%p482_p7)
}
  0xf8   : > { %s486_s27 = scalar_lea.hbm %s682_s11, 128  ;;  %s490_s4 = scalar_lea.hbm %s738_s3, 512 }
  0xf9   : > { %p487_p9 = scmp.ne.s32.totalorder %s682_s11, %s486_s27  ;;  %p491_p12 = scmp.lt.u32.totalorder %s682_s11, %s738_s3 }
  0xfa   : > { %p492_p13 = scmp.lt.u32.totalorder %s490_s4, %s486_s27  ;;  %p494_p1 = scmp.lt.u32.totalorder %s486_s27, %s682_s11 }
  0xfb   : > { %p488_p10 = pnand %p487_p9, %p643_p3 }
  0xfc   : > { %p493_p0 = por %p492_p13, %p491_p12 }
  0xfd   : > { %p489_p11 = pneg %p488_p10 }
  0xfe   : > { %p495_p2 = por %p494_p1, %p493_p0 }
 0x100   : > { %p496_p4 = pnand %p495_p2, %p489_p11 }
 0x102   : > { %499 = shalt.err (!%p496_p4)
}
 0x103   : > { %397 = dma.vmem_to_hbm [thread:$0]  (%p643_p3), %s684_s8, 128, %s682_s11, %s282_s16  }
 0x104 PF: > { %p403_p5 = scmp.ge.s32.totalorder %s566_s19, 2  ;;  %s309_s7 = sand.u32 1, %s538_s12  }
 0x105   : > { %s310_s9 = scalar_lea.sflag [#allocation3], %s309_s7 }
 0x106   : > { %p400_p6 = pnand %p403_p5, %p652_p8 }
 0x108   : > { %533 = dma.done.wait (!%p400_p6), %s310_s9, 128  }
 0x109   : > { %535 = vsyncadd (!%p400_p6), %s310_s9, 4294967168  ;;  %s16_s19 = sadd.s32 1, %s566_s19   ;;  %s741_s12 = smov %s542_s13 }
 0x10a   : > { %p13_p7 = scmp.ge.s32.totalorder %s16_s19, 6   ;;  %s742_s13 = smov %s546_s14 }
 0x10b   : > { %s743_s14 = smov %s661_s30  ;;  %s744_s15 = smov %s558_s17 }
 0x10c   : > { %s745_s16 = smov %s562_s18  ;;  %s746_s17 = smov %s749_s22 }
 0x10d   : > { %s747_s18 = smov %s753_s23  ;;  %15 = sbr.rel (!%p13_p7) target bundleno = 5 (0x5), region = 67 }
 0x114   :  { %315 = vsyncpa [#allocation3], 1 }
 0x115   :  { %317 = vsyncpa [#allocation3 + $0x1], 1 }

</bundles_post_ra>
